<compile_context>
chip_gen: v5e
topology: v5e:2x2
jax: 0.10.0
libtpu: 0.0.40
codegen_flags: <defaults>
</compile_context>

<pallas_src>
import functools

import jax
import jax.numpy as jnp
from jax.experimental import pallas as pl
from jax.experimental.pallas import tpu as pltpu

_LANE = 128
_ALIGN = 16  # bf16 sublane packing


def _round_up(x, m):
    return -(-x // m) * m


# --------------------------------------------------------------------------
# Fused path: whole MLP in one pallas_call, weights resident in VMEM.
# --------------------------------------------------------------------------
def _mlp_fused_kernel(x_ref, *refs, num_layers):
    """Chained (bf16 dot -> f32 acc + bias [-> relu]) stages over one row tile.

    refs layout: (w1, b1, ..., wL, bL, o_ref). Weights bf16, biases f32; all
    resident in VMEM (constant index_map, single-buffered). Only x / out tile.
    """
    o_ref = refs[-1]
    h = x_ref[...].astype(jnp.bfloat16)
    for i in range(num_layers):
        w = refs[2 * i][...]         # (K, N_pad) bf16, pre-transposed
        b = refs[2 * i + 1][...]     # (1, N_pad) f32
        acc = jnp.dot(h, w, preferred_element_type=jnp.float32) + b
        if i < num_layers - 1:
            acc = jnp.maximum(acc, 0.0)
            h = acc.astype(jnp.bfloat16)
        else:
            h = acc
    o_ref[...] = h.astype(o_ref.dtype)


def _tpu_generation_info():
    """Return (vmem_budget_bytes, multi_core) with conservative defaults."""
    phys = None
    cores = 1
    try:
        info = pltpu.get_tpu_info()
        phys = getattr(info, "vmem_capacity_bytes", None)
        cores = getattr(info, "num_cores", None) or getattr(info, "tensor_cores", None) or 1
    except Exception:
        pass
    kind = ""
    try:
        kind = jax.devices()[0].device_kind.lower()
    except Exception:
        pass
    is_v7 = ("v7" in kind) or ("7x" in kind)
    if phys is None:
        phys = (64 << 20) if is_v7 else (128 << 20)
    multi_core = is_v7 or cores >= 2
    budget = int(phys * 3 // 4)          # leave headroom under the physical cap
    return budget, multi_core


def _choose_tiling(m, per_row_bytes, fixed_bytes, vmem_budget, multi_core):
    """Pick (tm, m_pad) given the per-row / fixed VMEM footprint."""
    avail = vmem_budget - fixed_bytes
    tm_cap = max(_ALIGN, min(1024, (avail // max(per_row_bytes, 1)) // _ALIGN * _ALIGN))
    m_al = _round_up(m, _ALIGN)

    if not multi_core:
        # Single TensorCore: grid steps are a serial loop -> 1 step if it fits.
        if m_al <= tm_cap:
            return m_al, m_al
        tm = min(tm_cap, 512)
        if tm >= 256:
            tm = (tm // 256) * 256       # MXU-aligned large tiles (v6e 256-wide)
        return tm, _round_up(m_al, tm)

    # Multi-core (v7x): want >=2 "parallel" steps with an even count,
    # unless the problem is tiny.
    if m_al <= 2 * _ALIGN:
        return m_al, m_al
    steps = max(2, -(-m_al // min(tm_cap, 512)))
    if steps % 2:
        steps += 1
    tm = min(tm_cap, _round_up(-(-m_al // steps), _ALIGN))
    return tm, _round_up(m_al, tm)


def _mlp_forward_fused(prepared, x2, n_last_pad, out_dtype, vmem_budget, multi_core):
    m, input_dim = x2.shape
    num_layers = len(prepared) // 2
    max_n_pad = max(prepared[2 * i].shape[1] for i in range(num_layers))

    x_itemsize = jnp.dtype(x2.dtype).itemsize
    out_itemsize = jnp.dtype(out_dtype).itemsize
    per_row = 2 * x_itemsize * input_dim          # double-buffered input tile
    per_row += 2 * out_itemsize * n_last_pad      # double-buffered output tile
    per_row += 2 * 6 * max_n_pad                  # f32 acc + bf16 copy, 2 live
    weight_bytes = sum(int(a.size) * a.dtype.itemsize for a in prepared)
    fixed = weight_bytes + (2 << 20)              # resident params + scratch headroom

    tm, m_pad = _choose_tiling(m, per_row, fixed, vmem_budget, multi_core)
    if m_pad != m:
        x2 = jnp.pad(x2, ((0, m_pad - m), (0, 0)))  # rows only; K untouched

    grid = (m_pad // tm,)
    resident = pl.Buffered(1)  # constant index_map -> single VMEM buffer
    in_specs = [pl.BlockSpec((tm, input_dim), lambda i: (i, 0))]
    for li in range(num_layers):
        wk, wn = prepared[2 * li].shape
        in_specs.append(pl.BlockSpec((wk, wn), lambda i: (0, 0), pipeline_mode=resident))
        in_specs.append(pl.BlockSpec((1, wn), lambda i: (0, 0), pipeline_mode=resident))
    out_spec = pl.BlockSpec((tm, n_last_pad), lambda i: (i, 0))

    flops = 2 * m_pad * sum(prepared[2 * i].shape[0] * prepared[2 * i].shape[1]
                            for i in range(num_layers))
    bytes_accessed = (int(x2.size) * x_itemsize + weight_bytes
                      + m_pad * n_last_pad * out_itemsize)

    return pl.pallas_call(
        functools.partial(_mlp_fused_kernel, num_layers=num_layers),
        out_shape=jax.ShapeDtypeStruct((m_pad, n_last_pad), out_dtype),
        grid_spec=pltpu.PrefetchScalarGridSpec(
            num_scalar_prefetch=0,
            grid=grid,
            in_specs=in_specs,
            out_specs=out_spec,
        ),
        compiler_params=pltpu.CompilerParams(
            dimension_semantics=("parallel",),
            vmem_limit_bytes=int(vmem_budget)),
        cost_estimate=pl.CostEstimate(
            flops=int(flops), transcendentals=0, bytes_accessed=int(bytes_accessed)),
    )(x2, *prepared)


# --------------------------------------------------------------------------
# Fallback path: per-layer M/N/K-tiled matmul (+bias, +ReLU) when the weights
# are too large to keep fully resident in VMEM.
# --------------------------------------------------------------------------
def _linear_kernel(x_ref, w_ref, b_ref, o_ref, acc_ref, *, relu):
    @pl.when(pl.program_id(2) == 0)
    def _():
        acc_ref[...] = jnp.zeros_like(acc_ref)

    acc_ref[...] += jnp.dot(x_ref[...], w_ref[...],
                            preferred_element_type=jnp.float32)

    @pl.when(pl.program_id(2) == pl.num_programs(2) - 1)
    def _():
        r = acc_ref[...] + b_ref[...]
        if relu:
            r = jnp.maximum(r, 0.0)
        o_ref[...] = r.astype(o_ref.dtype)


def _largest_divisor_tile(dim, candidates):
    for c in candidates:
        if dim % c == 0:
            return c
    return dim


def _linear_tiled(x, w, b, *, relu, out_dtype):
    m, kdim = x.shape
    _, n = w.shape
    tm = _largest_divisor_tile(m, (256, 128, 64, 32, 16, 8))
    tn = _largest_divisor_tile(n, (512, 256, 128))
    tk = kdim if (kdim % _LANE) else _largest_divisor_tile(kdim, (512, 256, 128))
    grid = (m // tm, n // tn, kdim // tk)

    return pl.pallas_call(
        functools.partial(_linear_kernel, relu=relu),
        out_shape=jax.ShapeDtypeStruct((m, n), out_dtype),
        grid_spec=pltpu.PrefetchScalarGridSpec(
            num_scalar_prefetch=0,
            grid=grid,
            in_specs=[pl.BlockSpec((tm, tk), lambda i, j, k: (i, k)),
                      pl.BlockSpec((tk, tn), lambda i, j, k: (k, j)),
                      pl.BlockSpec((1, tn), lambda i, j, k: (0, j))],
            out_specs=pl.BlockSpec((tm, tn), lambda i, j, k: (i, j)),
            scratch_shapes=[pltpu.VMEM((tm, tn), jnp.float32)]),
        compiler_params=pltpu.CompilerParams(
            dimension_semantics=("parallel", "parallel", "arbitrary")),
    )(x, w, b)


def _mlp_forward_tiled(prepared, x2, out_dtype):
    m = x2.shape[0]
    m_pad = _round_up(m, _ALIGN)
    if m_pad != m:
        x2 = jnp.pad(x2, ((0, m_pad - m), (0, 0)))
    num_layers = len(prepared) // 2
    h = x2.astype(jnp.bfloat16)
    for i in range(num_layers):
        last = (i == num_layers - 1)
        h = _linear_tiled(h, prepared[2 * i], prepared[2 * i + 1],
                          relu=not last,
                          out_dtype=out_dtype if last else jnp.bfloat16)
    return h


# --------------------------------------------------------------------------
# Parameter preparation + public forward
# --------------------------------------------------------------------------
def prepare_mlp_params(params, *, weight_dtype=jnp.bfloat16):
    """Pad + pre-transpose weights once, outside the hot path.

    params: list of (w, b) with torch nn.Linear shapes w:(out,in), b:(out,).
    Weights -> bf16 lane-dense (K, N_pad); first layer keeps K=input_dim so x
    never needs feature-padding. Biases stay f32 (tiny, keeps precision).
    """
    prepared = []
    input_dim = params[0][0].shape[1]
    output_dim = params[-1][0].shape[0]
    for li, (w, b) in enumerate(params):
        n_out, n_in = w.shape
        kp = n_in if li == 0 else _round_up(n_in, _LANE)
        np_ = _round_up(n_out, _LANE)
        w_t = jnp.zeros((kp, np_), weight_dtype).at[:n_in, :n_out].set(
            w.T.astype(weight_dtype))
        b_p = jnp.zeros((1, np_), jnp.float32).at[0, :n_out].set(
            b.astype(jnp.float32))
        prepared.append(w_t)
        prepared.append(b_p)
    return prepared, input_dim, output_dim


def mlp_forward(prepared, input_dim, output_dim, x, *, out_dtype=jnp.float32,
                mode="auto"):
    """x: (..., input_dim) -> (..., output_dim), fused Linear/ReLU chain."""
    lead = x.shape[:-1]
    x2 = x.reshape(-1, input_dim)
    m = x2.shape[0]
    n_last_pad = prepared[-2].shape[1]

    weight_bytes = sum(int(a.size) * a.dtype.itemsize for a in prepared)
    vmem_budget, multi_core = _tpu_generation_info()

    if mode == "auto":
        mode = "fused" if weight_bytes <= int(0.6 * vmem_budget) else "tiled"

    if mode == "fused":
        out2 = _mlp_forward_fused(prepared, x2, n_last_pad, out_dtype,
                                  vmem_budget, multi_core)
    else:
        out2 = _mlp_forward_tiled(prepared, x2, out_dtype)

    return out2[:m, :output_dim].reshape(*lead, output_dim)


# --------------------------------------------------------------------------
# Reference + test
# --------------------------------------------------------------------------
def init_mlp_params(key, input_dim, hidden_dim, output_dim, num_layers):
    """Deterministic params matching nn.Linear shapes: weight (out,in), bias (out,)."""
    h = [hidden_dim] * (num_layers - 1)
    dims_in = [input_dim] + h
    dims_out = h + [output_dim]
    params = []
    for n, k in zip(dims_in, dims_out):
        key, wk, bk = jax.random.split(key, 3)
        bound = 1.0 / (n ** 0.5)  # torch.nn.Linear default init scheme
        w = jax.random.uniform(wk, (k, n), jnp.float32, -bound, bound)
        b = jax.random.uniform(bk, (k,), jnp.float32, -bound, bound)
        params.append((w, b))
    return params


def mlp_reference(params, x):
    num_layers = len(params)
    for i, (w, b) in enumerate(params):
        x = x @ w.T + b
        if i < num_layers - 1:
            x = jnp.maximum(x, 0.0)
    return x


if __name__ == "__main__":
    key = jax.random.PRNGKey(0)
    batch, seq = 2, 8
    input_dim, hidden_dim, output_dim, num_layers = 16, 32, 4, 3

    key, pkey, xkey = jax.random.split(key, 3)
    params = init_mlp_params(pkey, input_dim, hidden_dim, output_dim, num_layers)
    x = jax.random.normal(xkey, (batch, seq, input_dim), jnp.float32)

    # One-time weight prep (pad + transpose + bf16 cast) outside the hot path.
    prepared, in_dim, out_dim = prepare_mlp_params(params)
    ref = mlp_reference(params, x)

    # Fused (weights-resident) path.
    out = mlp_forward(prepared, in_dim, out_dim, x)
    out = jax.block_until_ready(out)
    assert out.shape == (batch, seq, output_dim)
    # bf16 MXU with f32 accumulate -> loosened tolerance vs f32 reference.
    assert jnp.allclose(out, ref, atol=5e-2, rtol=5e-2), "fused mismatch vs reference"

    # Tiled fallback path (used automatically when weights exceed VMEM budget).
    out_t = mlp_forward(prepared, in_dim, out_dim, x, mode="tiled")
    out_t = jax.block_until_ready(out_t)
    assert jnp.allclose(out_t, ref, atol=5e-2, rtol=5e-2), "tiled mismatch vs reference"

    print("KERNEL_OK")
</pallas_src>

<mosaic_0001>
module attributes {stable_mosaic.version = 11 : i64} {
  func.func @_mlp_fused_kernel(%arg0: i32, %arg1: memref<16x16xf32, #tpu.memory_space<vmem>>, %arg2: memref<16x128xbf16, #tpu.memory_space<vmem>>, %arg3: memref<1x128xf32, #tpu.memory_space<vmem>>, %arg4: memref<128x128xbf16, #tpu.memory_space<vmem>>, %arg5: memref<1x128xf32, #tpu.memory_space<vmem>>, %arg6: memref<128x128xbf16, #tpu.memory_space<vmem>>, %arg7: memref<1x128xf32, #tpu.memory_space<vmem>>, %arg8: memref<16x128xf32, #tpu.memory_space<vmem>>) attributes {dimension_semantics = [#tpu.dimension_semantics<parallel>], iteration_bounds = array<i64: 1>, scalar_prefetch = 0 : i64, scratch_operands = 0 : i64, tpu.core_type = #tpu.core_type<tc>, window_params = [{transform_indices = @transform_0, window_bounds = array<i64: 16, 16>}, {pipeline_mode = #tpu.pipeline_mode<synchronous>, transform_indices = @transform_1, window_bounds = array<i64: 16, 128>}, {pipeline_mode = #tpu.pipeline_mode<synchronous>, transform_indices = @transform_2, window_bounds = array<i64: 1, 128>}, {pipeline_mode = #tpu.pipeline_mode<synchronous>, transform_indices = @transform_3, window_bounds = array<i64: 128, 128>}, {pipeline_mode = #tpu.pipeline_mode<synchronous>, transform_indices = @transform_4, window_bounds = array<i64: 1, 128>}, {pipeline_mode = #tpu.pipeline_mode<synchronous>, transform_indices = @transform_5, window_bounds = array<i64: 128, 128>}, {pipeline_mode = #tpu.pipeline_mode<synchronous>, transform_indices = @transform_6, window_bounds = array<i64: 1, 128>}, {transform_indices = @transform_7, window_bounds = array<i64: 16, 128>}]} {
    %c0 = arith.constant 0 : index
    %c0_0 = arith.constant 0 : index
    %0 = vector.load %arg1[%c0, %c0_0] : memref<16x16xf32, #tpu.memory_space<vmem>>, vector<16x16xf32>
    %1 = arith.truncf %0 : vector<16x16xf32> to vector<16x16xbf16>
    %c0_1 = arith.constant 0 : index
    %c0_2 = arith.constant 0 : index
    %2 = vector.load %arg2[%c0_1, %c0_2] : memref<16x128xbf16, #tpu.memory_space<vmem>>, vector<16x128xbf16>
    %c0_3 = arith.constant 0 : index
    %c0_4 = arith.constant 0 : index
    %3 = vector.load %arg3[%c0_3, %c0_4] : memref<1x128xf32, #tpu.memory_space<vmem>>, vector<1x128xf32>
    %cst = arith.constant dense<0.000000e+00> : vector<16x128xf32>
    %4 = tpu.matmul %1, %2, %cst {dimension_numbers = #tpu.dot_dimension_numbers<[1], [0], [0], [1], [0, 0, 1, 1], [], []>} : vector<16x16xbf16>, vector<16x128xbf16>, vector<16x128xf32> -> vector<16x128xf32>
    %5 = vector.broadcast %3 : vector<1x128xf32> to vector<16x128xf32>
    %6 = arith.addf %4, %5 : vector<16x128xf32>
    %cst_5 = arith.constant 0.000000e+00 : f32
    %7 = vector.broadcast %cst_5 : f32 to vector<16x128xf32>
    %8 = arith.maximumf %6, %7 : vector<16x128xf32>
    %9 = arith.truncf %8 : vector<16x128xf32> to vector<16x128xbf16>
    %c0_6 = arith.constant 0 : index
    %c0_7 = arith.constant 0 : index
    %10 = vector.load %arg4[%c0_6, %c0_7] : memref<128x128xbf16, #tpu.memory_space<vmem>>, vector<128x128xbf16>
    %c0_8 = arith.constant 0 : index
    %c0_9 = arith.constant 0 : index
    %11 = vector.load %arg5[%c0_8, %c0_9] : memref<1x128xf32, #tpu.memory_space<vmem>>, vector<1x128xf32>
    %cst_10 = arith.constant dense<0.000000e+00> : vector<16x128xf32>
    %12 = tpu.matmul %9, %10, %cst_10 {dimension_numbers = #tpu.dot_dimension_numbers<[1], [0], [0], [1], [0, 0, 1, 1], [], []>} : vector<16x128xbf16>, vector<128x128xbf16>, vector<16x128xf32> -> vector<16x128xf32>
    %13 = vector.broadcast %11 : vector<1x128xf32> to vector<16x128xf32>
    %14 = arith.addf %12, %13 : vector<16x128xf32>
    %cst_11 = arith.constant 0.000000e+00 : f32
    %15 = vector.broadcast %cst_11 : f32 to vector<16x128xf32>
    %16 = arith.maximumf %14, %15 : vector<16x128xf32>
    %17 = arith.truncf %16 : vector<16x128xf32> to vector<16x128xbf16>
    %c0_12 = arith.constant 0 : index
    %c0_13 = arith.constant 0 : index
    %18 = vector.load %arg6[%c0_12, %c0_13] : memref<128x128xbf16, #tpu.memory_space<vmem>>, vector<128x128xbf16>
    %c0_14 = arith.constant 0 : index
    %c0_15 = arith.constant 0 : index
    %19 = vector.load %arg7[%c0_14, %c0_15] : memref<1x128xf32, #tpu.memory_space<vmem>>, vector<1x128xf32>
    %cst_16 = arith.constant dense<0.000000e+00> : vector<16x128xf32>
    %20 = tpu.matmul %17, %18, %cst_16 {dimension_numbers = #tpu.dot_dimension_numbers<[1], [0], [0], [1], [0, 0, 1, 1], [], []>} : vector<16x128xbf16>, vector<128x128xbf16>, vector<16x128xf32> -> vector<16x128xf32>
    %21 = vector.broadcast %19 : vector<1x128xf32> to vector<16x128xf32>
    %22 = arith.addf %20, %21 : vector<16x128xf32>
    %c0_17 = arith.constant 0 : index
    %c0_18 = arith.constant 0 : index
    %23 = vector.load %arg8[%c0_17, %c0_18] : memref<16x128xf32, #tpu.memory_space<vmem>>, vector<16x128xf32>
    tpu.vector_store %arg8[%c0_17, %c0_18], %22 {strides = array<i32>} : memref<16x128xf32, #tpu.memory_space<vmem>>, vector<16x128xf32>,
    return
  }
  func.func @transform_0(%arg0: i32) -> (i32, i32) {
    %c0_i32 = arith.constant 0 : i32
    %c0_i32_0 = arith.constant 0 : i32
    return %arg0, %c0_i32 : i32, i32
  }
  func.func @transform_1(%arg0: i32) -> (i32, i32) {
    %c0_i32 = arith.constant 0 : i32
    %c0_i32_0 = arith.constant 0 : i32
    %c0_i32_1 = arith.constant 0 : i32
    return %c0_i32, %c0_i32_0 : i32, i32
  }
  func.func @transform_2(%arg0: i32) -> (i32, i32) {
    %c0_i32 = arith.constant 0 : i32
    %c0_i32_0 = arith.constant 0 : i32
    %c0_i32_1 = arith.constant 0 : i32
    return %c0_i32, %c0_i32_0 : i32, i32
  }
  func.func @transform_3(%arg0: i32) -> (i32, i32) {
    %c0_i32 = arith.constant 0 : i32
    %c0_i32_0 = arith.constant 0 : i32
    %c0_i32_1 = arith.constant 0 : i32
    return %c0_i32, %c0_i32_0 : i32, i32
  }
  func.func @transform_4(%arg0: i32) -> (i32, i32) {
    %c0_i32 = arith.constant 0 : i32
    %c0_i32_0 = arith.constant 0 : i32
    %c0_i32_1 = arith.constant 0 : i32
    return %c0_i32, %c0_i32_0 : i32, i32
  }
  func.func @transform_5(%arg0: i32) -> (i32, i32) {
    %c0_i32 = arith.constant 0 : i32
    %c0_i32_0 = arith.constant 0 : i32
    %c0_i32_1 = arith.constant 0 : i32
    return %c0_i32, %c0_i32_0 : i32, i32
  }
  func.func @transform_6(%arg0: i32) -> (i32, i32) {
    %c0_i32 = arith.constant 0 : i32
    %c0_i32_0 = arith.constant 0 : i32
    %c0_i32_1 = arith.constant 0 : i32
    return %c0_i32, %c0_i32_0 : i32, i32
  }
  func.func @transform_7(%arg0: i32) -> (i32, i32) {
    %c0_i32 = arith.constant 0 : i32
    %c0_i32_0 = arith.constant 0 : i32
    return %arg0, %c0_i32 : i32, i32
  }
}

</mosaic_0001>

<bundles_post_ra>
// kernel: tpu_custom_call.1
= control target key start
LH: loop header
LB: loop body
LE: loop exit
PB: predicated region body
PF: predicated region fallthrough
CT: control target
= control target key end

     0   :  { %12 = vsyncpa [#allocation3], 0  ;;  %s622_s0 = inlined_call_operand.hbm [shape: f32[16,16], index: 0, kind: input, shape index: {}]   ;;  %s623_s1 = inlined_call_operand.hbm [shape: bf16[16,128], index: 1, kind: input, shape index: {}]   ;;  %s624_s2 = inlined_call_operand.vmem [shape: f32[1,128], index: 2, kind: input, shape index: {}]   ;;  %s625_s3 = inlined_call_operand.hbm [shape: bf16[128,128], index: 3, kind: input, shape index: {}]   ;;  %s626_s4 = inlined_call_operand.vmem [shape: f32[1,128], index: 4, kind: input, shape index: {}]   ;;  %s627_s5 = inlined_call_operand.hbm [shape: bf16[128,128], index: 5, kind: input, shape index: {}]   ;;  %s628_s6 = inlined_call_operand.vmem [shape: f32[1,128], index: 6, kind: input, shape index: {}]   ;;  %s629_s7 = inlined_call_operand.hbm [shape: f32[16,128], index: 7, kind: output, shape index: {}]  }
   0x1   :  { %13 = vsyncpa [#allocation6], 0 }
   0x2   :  { %14 = vsyncpa [#allocation9], 0  ;;  %s33_s26 = sshll.u32 %s623_s1, 4  ;;  %s34_s26 = int_to_ptr.hbm [resolvable:$true] %s33_s26 }
   0x3   :  { %15 = vsyncpa [#allocation4], 0  ;;  %s543_s27 = smov [#allocation5]   ;;  %s20_s8 = sshll.u32 %s622_s0, 4  ;;  %s21_s8 = int_to_ptr.hbm [resolvable:$true] %s20_s8 }
   0x4   :  { %s35_s28 = sshll.u32 %s543_s27, 4  ;;  %s544_s9 = smov 64   ;;  %s36_s28 = int_to_ptr.vmem [resolvable:$true] %s35_s28 }
   0x5   :  { %s545_s10 = smov 4   ;;  %s546_s11 = smov [#allocation2]  }
   0x6   :  { %41 = dma.hbm_to_vmem [thread:$0]  %s34_s26, 128, %s36_s28, [#allocation6], %s544_s9, %s544_s9, %s545_s10  }
   0x7   :  { %s22_s12 = sshll.u32 %s546_s11, 4  ;;  %s547_s13 = smov 128   ;;  %s23_s12 = int_to_ptr.vmem [resolvable:$true] %s22_s12 }
   0x8   :  { %s548_s14 = smov 8   ;;  %s48_s16 = sshll.u32 %s625_s3, 4  ;;  %s49_s16 = int_to_ptr.hbm [resolvable:$true] %s48_s16 }
   0x9   :  { %28 = dma.hbm_to_vmem [thread:$0]  %s21_s8, 256, %s23_s12, [#allocation3], %s547_s13, %s547_s13, %s548_s14  }
   0xa   :  { %s549_s17 = smov [#allocation7]   ;;  %s63_s20 = sshll.u32 %s627_s5, 4  ;;  %s64_s20 = int_to_ptr.hbm [resolvable:$true] %s63_s20 }
   0xb   :  { %s50_s0 = sshll.u32 %s549_s17, 4  ;;  %s550_s21 = smov [#allocation8]   ;;  %s51_s0 = int_to_ptr.vmem [resolvable:$true] %s50_s0 }
   0xc   :  { %56 = dma.hbm_to_vmem [thread:$0]  %s49_s16, 1024, %s51_s0, [#allocation6], %s544_s9, %s544_s9, %s545_s10  }
   0xd   :  { %s65_s22 = sshll.u32 %s550_s21, 4  ;;  %s66_s22 = int_to_ptr.vmem [resolvable:$true] %s65_s22 }
   0xe   :  { %71 = dma.hbm_to_vmem [thread:$0]  %s64_s20, 1024, %s66_s22, [#allocation9], %s544_s9, %s544_s9, %s545_s10  }
   0xf   :  { %535 = dma.done.wait [#allocation3], 256  }
  0x10   :  { %536 = vsyncadd [#allocation3], 4294967040 }
  0x11   :  { %537 = dma.done.wait [#allocation6], 1152  }
  0x12   :  { %538 = vsyncadd [#allocation6], 4294966144 }
  0x13   :  { %539 = dma.done.wait [#allocation9], 1024  }
  0x14   :  { %540 = vsyncadd [#allocation9], 4294966272  ;;  %v386_v0 = vld [vmem:[#allocation5] sm:$0xff]  ;;  %v91_v1 = vld [vmem:[#allocation2] sm:$0xff]  ;;  %vm106_vm0 = vcmask 130048   ;;  %s551_s26 = smov [#allocation10]  }
  0x15   :  { %v92_v2 = vld [vmem:[#allocation2 + $0x8] sm:$0xff]  ;;  %v394_v4 = vld [vmem:[#allocation7 + $0x38] sm:$0xff]  ;;  %117 = vmatpush.bf16.msra.mxu0 %v386_v0  ;;  %v392_v6 = vld [vmem:[#allocation7 + $0x28] sm:$0xff]  ;;  %s300_s27 = sshll.u32 %s551_s26, 4  ;;  %s301_s27 = int_to_ptr.vmem [resolvable:$true] %s300_s27 }
  0x16   :  { %v93_v3 = vpack.c.bf16 %v92_v2, %v91_v1  ;;  %195 = vmatpush.bf16.msra.mxu1 %v394_v4  ;;  %v393_v5 = vld [vmem:[#allocation7 + $0x30] sm:$0xff]  ;;  %v391_v7 = vld [vmem:[#allocation7 + $0x20] sm:$0xff]  ;;  %v390_v8 = vld [vmem:[#allocation7 + $0x18] sm:$0xff] }
  0x17   :  { %v389_v9 = vld [vmem:[#allocation7 + $0x10] sm:$0xff]  ;;  %v388_v10 = vld [vmem:[#allocation7 + $0x8] sm:$0xff]  ;;  %v387_v11 = vld [vmem:[#allocation7] sm:$0xff] }
  0x18   :  { %321 = vmatmul.msk.bf16.vlgmr.msra.gmra.mxu0 %vm106_vm0, %v93_v3  ;;  %v402_v12 = vld [vmem:[#allocation8 + $0x38] sm:$0xff]  ;;  %v401_v13 = vld [vmem:[#allocation8 + $0x30] sm:$0xff]  ;;  %v400_v14 = vld [vmem:[#allocation8 + $0x28] sm:$0xff] }
  0x19   :  { %280 = vmatpush.bf16.msra.mxu2 %v402_v12  ;;  %v399_v15 = vld [vmem:[#allocation8 + $0x20] sm:$0xff]  ;;  %v412_v17 = vld [vmem:[%s624_s2] ss:$0 sm:$0xff]  ;;  %v398_v24 = vld [vmem:[#allocation8 + $0x18] sm:$0xff] }
  0x1a   :  { %196 = vmatpush.bf16.msra.mxu1 %v393_v5  ;;  %v397_v25 = vld [vmem:[#allocation8 + $0x10] sm:$0xff]  ;;  %v396_v26 = vld [vmem:[#allocation8 + $0x8] sm:$0xff]  ;;  %v395_v27 = vld [vmem:[#allocation8] sm:$0xff] }
  0x1b   :  { %v413_v29 = vld [vmem:[%s626_s4] ss:$0 sm:$0xff]  ;;  %s302_s4 = sshll.u32 %s629_s7, 4  ;;  %s303_s4 = int_to_ptr.hbm [resolvable:$true] %s302_s4 }
  0x1c   :  { %v414_v36 = vld [vmem:[%s628_s6] ss:$0 sm:$0xff] }
  0x1d   :  { %281 = vmatpush.bf16.msra.mxu2 %v401_v13 }
  0x1e   :  { %197 = vmatpush.bf16.msra.mxu1 %v392_v6 }
  0x21   :  { %282 = vmatpush.bf16.msra.mxu2 %v400_v14 }
  0x22   :  { %198 = vmatpush.bf16.msra.mxu1 %v391_v7 }
  0x25   :  { %283 = vmatpush.bf16.msra.mxu2 %v399_v15 }
  0x26   :  { %199 = vmatpush.bf16.msra.mxu1 %v390_v8 }
  0x29   :  { %284 = vmatpush.bf16.msra.mxu2 %v398_v24 }
  0x2a   :  { %200 = vmatpush.bf16.msra.mxu1 %v389_v9 }
  0x2d   :  { %285 = vmatpush.bf16.msra.mxu2 %v397_v25 }
  0x2e   :  { %201 = vmatpush.bf16.msra.mxu1 %v388_v10 }
  0x31   :  { %286 = vmatpush.bf16.msra.mxu2 %v396_v26 }
  0x32   :  { %202 = vmatpush.bf16.msra.mxu1 %v387_v11 }
  0x35   :  { %287 = vmatpush.bf16.msra.mxu2 %v395_v27 }
  0x95   :  { %v119_v16 = vpop.f32.mrf.mxu0 }
  0x96   :  { %v120_v18 = vadd.f32 %v412_v17, %v119_v16 }
  0x98   :  { %v124_v21 = vmax.f32 %v120_v18, 0.0 }
  0x9d   :  { %v121_v19 = vpop.f32.mrf.mxu0 }
  0x9e   :  { %v122_v20 = vadd.f32 %v412_v17, %v121_v19 }
  0xa0   :  { %v125_v22 = vmax.f32 %v122_v20, 0.0 }
  0xa2   :  { %v126_v23 = vpack.c.bf16 %v125_v22, %v124_v21 }
  0xa4   :  { %203 = vmatmul.bf16.vlgmr.msra.gmra.mxu1 %v126_v23 }
 0x121   :  { %v204_v28 = vpop.f32.mrf.mxu1 }
 0x122   :  { %v205_v30 = vadd.f32 %v413_v29, %v204_v28 }
 0x124   :  { %v209_v33 = vmax.f32 %v205_v30, 0.0 }
 0x129   :  { %v206_v31 = vpop.f32.mrf.mxu1 }
 0x12a   :  { %v207_v32 = vadd.f32 %v413_v29, %v206_v31 }
 0x12c   :  { %v210_v34 = vmax.f32 %v207_v32, 0.0 }
 0x12e   :  { %v211_v35 = vpack.c.bf16 %v210_v34, %v209_v33 }
 0x130   :  { %288 = vmatmul.bf16.vlgmr.msra.gmra.mxu2 %v211_v35 }
 0x1b3   :  { %v289_v37 = vpop.f32.mrf.mxu2 }
 0x1b4   :  { %v290_v38 = vadd.f32 %v414_v36, %v289_v37 }
 0x1b6   :  { %294 = vst [vmem:[#allocation10] sm:$0xff] %v290_v38 }
 0x1bb   :  { %v291_v39 = vpop.f32.mrf.mxu2 }
 0x1bc   :  { %v292_v40 = vadd.f32 %v414_v36, %v291_v39 }
 0x1be   :  { %295 = vst [vmem:[#allocation10 + $0x8] sm:$0xff] %v292_v40 }
 0x1bf   :  { %308 = dma.vmem_to_hbm [thread:$0]  %s301_s27, 256, %s303_s4, [#allocation4], %s547_s13, %s547_s13, %s548_s14  }
 0x1c0   :  { %541 = dma.done.wait [#allocation4], 256  }
 0x1c1   :  { %542 = vsyncadd [#allocation4], 4294967040 }
 0x1c2   :  { %313 = vsyncpa [#allocation3], 1 }
 0x1c3   :  { %314 = vsyncpa [#allocation6], 1 }
 0x1c4   :  { %315 = vsyncpa [#allocation9], 1 }
 0x1c5   :  { %316 = vsyncpa [#allocation4], 1 }

</bundles_post_ra>
